<compile_context>
chip_gen: v7x
topology: tpu7x:2x2x1
jax: 0.10.0
libtpu: 0.0.40
codegen_flags: <defaults>
</compile_context>

<pallas_src>
import functools

import jax
import jax.numpy as jnp
from jax.experimental import pallas as pl
from jax.experimental.pallas import tpu as pltpu

# ---- model hyper-parameters (HORIZON was a free global in the reference code) ----
N_SERIES = 5
HORIZON = 7
HIDDEN = 32
B = 2
L = 8
D = N_SERIES + 3      # GCNConv in_channels = n_series + 3  -> seq feature dim
HORIZON_PAD = 8       # head output padded to 8 lanes; sliced back to 7 outside the kernel


def _round_up(v, m):
    return (v + m - 1) // m * m


def _tgnn_kernel(x_ref, w_ref, b_ref, out_ref, *, dot_dtype, n_rows, seq_len, n_batch,
                 in_dim, hidden, horizon_pad, offs):
    f32 = jnp.float32
    r_m, r_wg, r_wt0, r_wt1, r_wt2, r_seg, r_wh = offs

    # ---------- GCNConv:  relu( M @ (x @ Wg) + bg )  with M = D^-1/2 (A+I)^T D^-1/2 ----------
    xw = jnp.dot(x_ref[...], w_ref[r_wg:r_wg + in_dim, 0:hidden],
                 preferred_element_type=f32)                                     # (N, H)
    m = w_ref[r_m:r_m + n_rows, 0:n_rows]                                        # (N, N)
    gc = jnp.dot(m, xw.astype(dot_dtype), preferred_element_type=f32) + b_ref[0:1, 0:hidden]
    x_gc = jnp.maximum(gc, 0.0)                                                  # (N, H) f32

    # ---------- TCN: Conv1d(H, H, k=3, dilation=2, padding=2) over time ----------
    # taps x[t-2] / x[t] / x[t+2] via XLU sublane rolls; batch-boundary masks rebuilt
    # in-kernel (iota + compare, 2 VPU ops); three K=H dots against static sublane slabs
    # of the weight slab, summed in f32 (no lane-axis concat / (N,3H) intermediate).
    t_idx = jax.lax.broadcasted_iota(jnp.int32, (n_rows, hidden), 0) % seq_len
    x_m2 = jnp.where(t_idx >= 2, pltpu.roll(x_gc, 2, axis=0), 0.0)               # x[t-2]
    x_p2 = jnp.where(t_idx < seq_len - 2, pltpu.roll(x_gc, n_rows - 2, axis=0), 0.0)  # x[t+2]

    h = (jnp.dot(x_m2.astype(dot_dtype), w_ref[r_wt0:r_wt0 + hidden, 0:hidden],
                 preferred_element_type=f32)
         + jnp.dot(x_gc.astype(dot_dtype), w_ref[r_wt1:r_wt1 + hidden, 0:hidden],
                   preferred_element_type=f32)
         + jnp.dot(x_p2.astype(dot_dtype), w_ref[r_wt2:r_wt2 + hidden, 0:hidden],
                   preferred_element_type=f32))
    h = jnp.maximum(h + b_ref[8:9, 0:hidden], 0.0)                               # (N, H) f32

    # ---------- mean over time per sequence (segment matmul) + head ----------
    seg = w_ref[r_seg:r_seg + n_batch, 0:n_rows]                                 # (B, N)
    h_mean = jnp.dot(seg, h.astype(dot_dtype), preferred_element_type=f32)       # (B, H)
    wh = w_ref[r_wh:r_wh + hidden, 0:horizon_pad]                                # (H, HP)
    out_ref[...] = (jnp.dot(h_mean.astype(dot_dtype), wh, preferred_element_type=f32)
                    + b_ref[16:17, 0:horizon_pad])                               # (B, HP)


def tgnn_forward(seq, params, *, use_bf16_matmul=True):
    """seq: (B, L, D) float32.  Returns (out (B, HORIZON), A (n_series, n_series))."""
    f32 = jnp.float32
    B_, L_, D_ = seq.shape
    N_ = B_ * L_
    n = params["A_logits"].shape[0]
    H_ = params["gc_w"].shape[0]
    horizon = params["head_w"].shape[0]
    dot_dtype = jnp.bfloat16 if use_bf16_matmul else f32

    # ---- graph learner (parameter-only; returned directly, no kernel output needed) ----
    A = jax.nn.sigmoid(params["A_logits"].astype(f32)) * (1.0 - jnp.eye(n, dtype=f32))

    # ---- GCN normalisation hoisted to host (parameter-only, seq-independent) ----
    # PyG gcn_norm: deg_i = 1 + sum_j A[j, i];  out_i = d_i^-1/2 * sum_j Ahat[j,i] d_j^-1/2 x'_j
    deg = 1.0 + jnp.sum(A, axis=0)                                    # (n,)
    dis = jnp.ones((N_,), f32).at[:n].set(jax.lax.rsqrt(deg))         # padded nodes: deg 1
    ahat_t = jnp.eye(N_, dtype=f32).at[:n, :n].add(A.T)               # (A + I)^T, padded
    M = dis[:, None] * ahat_t * dis[None, :]                          # (N, N) f32

    # ---- pack all constant matmul operands into ONE lane-aligned dot-dtype slab ----
    # Every sub-array starts at a sublane offset that is a multiple of 16 (bf16 sublane
    # tile), lane widths padded with zeros to the slab width.  One DMA instead of seven.
    lanes = max(H_, N_, HORIZON_PAD)
    r_m = 0
    r_wg = r_m + _round_up(N_, 16)
    r_wt0 = r_wg + _round_up(D_, 16)
    r_wt1 = r_wt0 + _round_up(H_, 16)
    r_wt2 = r_wt1 + _round_up(H_, 16)
    r_seg = r_wt2 + _round_up(H_, 16)
    r_wh = r_seg + _round_up(B_, 16)
    rows_total = r_wh + _round_up(H_, 16)

    rows = jnp.arange(N_)
    seg = ((rows[None, :] // L_) == jnp.arange(B_)[:, None]).astype(f32) / float(L_)  # (B, N)

    w_slab = jnp.zeros((rows_total, lanes), f32)
    w_slab = w_slab.at[r_m:r_m + N_, :N_].set(M)
    w_slab = w_slab.at[r_wg:r_wg + D_, :H_].set(params["gc_w"].T.astype(f32))
    for k, r in enumerate((r_wt0, r_wt1, r_wt2)):
        w_slab = w_slab.at[r:r + H_, :H_].set(params["tcn_w"][:, :, k].T.astype(f32))
    w_slab = w_slab.at[r_seg:r_seg + B_, :N_].set(seg)
    w_slab = w_slab.at[r_wh:r_wh + H_, :horizon].set(params["head_w"].T.astype(f32))
    w_slab = w_slab.astype(dot_dtype)

    # ---- biases kept in a small separate f32 slab (DMA-count reduction only; the adds
    #      stay in f32 exactly as before) ----
    b_slab = jnp.zeros((24, lanes), f32)
    b_slab = b_slab.at[0, :H_].set(params["gc_b"].astype(f32))
    b_slab = b_slab.at[8, :H_].set(params["tcn_b"].astype(f32))
    b_slab = b_slab.at[16, :horizon].set(params["head_b"].astype(f32))

    x_flat = seq.reshape(N_, D_).astype(dot_dtype)

    kernel = functools.partial(
        _tgnn_kernel, dot_dtype=dot_dtype, n_rows=N_, seq_len=L_, n_batch=B_,
        in_dim=D_, hidden=H_, horizon_pad=HORIZON_PAD,
        offs=(r_m, r_wg, r_wt0, r_wt1, r_wt2, r_seg, r_wh))
    vmem = lambda: pl.BlockSpec(memory_space=pltpu.MemorySpace.VMEM)

    out_pad = pl.pallas_call(
        kernel,
        out_shape=jax.ShapeDtypeStruct((B_, HORIZON_PAD), f32),
        in_specs=[vmem(), vmem(), vmem()],
        out_specs=vmem(),
    )(x_flat, w_slab, b_slab)

    return out_pad[:, :horizon], A


if __name__ == "__main__":
    key = jax.random.PRNGKey(0)
    ks = jax.random.split(key, 8)
    params = {
        "A_logits": jax.random.normal(ks[0], (N_SERIES, N_SERIES), jnp.float32),
        "gc_w": jax.random.normal(ks[1], (HIDDEN, D), jnp.float32) * 0.1,
        "gc_b": jax.random.normal(ks[2], (HIDDEN,), jnp.float32) * 0.1,
        "tcn_w": jax.random.normal(ks[3], (HIDDEN, HIDDEN, 3), jnp.float32) * 0.1,
        "tcn_b": jax.random.normal(ks[4], (HIDDEN,), jnp.float32) * 0.1,
        "head_w": jax.random.normal(ks[5], (HORIZON, HIDDEN), jnp.float32) * 0.1,
        "head_b": jax.random.normal(ks[6], (HORIZON,), jnp.float32) * 0.1,
    }
    seq = jax.random.normal(ks[7], (B, L, D), jnp.float32)

    out, A = jax.jit(tgnn_forward)(seq, params)
    jax.block_until_ready((out, A))
    assert out.shape == (B, HORIZON) and A.shape == (N_SERIES, N_SERIES)
    print("KERNEL_OK")
</pallas_src>

<mosaic_0001>
module attributes {stable_mosaic.version = 11 : i64} {
  func.func @_tgnn_kernel(%arg0: memref<16x8xbf16, #tpu.memory_space<vmem>>, %arg1: memref<176x32xbf16, #tpu.memory_space<vmem>>, %arg2: memref<24x32xf32, #tpu.memory_space<vmem>>, %arg3: memref<2x8xf32, #tpu.memory_space<vmem>>) attributes {dimension_semantics = [], scalar_prefetch = 0 : i64, scratch_operands = 0 : i64, tpu.core_type = #tpu.core_type<tc>} {
    %c0 = arith.constant 0 : index
    %c0_0 = arith.constant 0 : index
    %0 = vector.load %arg0[%c0, %c0_0] : memref<16x8xbf16, #tpu.memory_space<vmem>>, vector<16x8xbf16>
    %c16 = arith.constant 16 : index
    %c0_1 = arith.constant 0 : index
    %1 = vector.load %arg1[%c16, %c0_1] : memref<176x32xbf16, #tpu.memory_space<vmem>>, vector<8x32xbf16>
    %cst = arith.constant dense<0.000000e+00> : vector<16x32xf32>
    %2 = tpu.matmul %0, %1, %cst {dimension_numbers = #tpu.dot_dimension_numbers<[1], [0], [0], [1], [0, 0, 1, 1], [], []>} : vector<16x8xbf16>, vector<8x32xbf16>, vector<16x32xf32> -> vector<16x32xf32>
    %c0_2 = arith.constant 0 : index
    %c0_3 = arith.constant 0 : index
    %3 = vector.load %arg1[%c0_2, %c0_3] : memref<176x32xbf16, #tpu.memory_space<vmem>>, vector<16x16xbf16>
    %4 = arith.truncf %2 : vector<16x32xf32> to vector<16x32xbf16>
    %cst_4 = arith.constant dense<0.000000e+00> : vector<16x32xf32>
    %5 = tpu.matmul %3, %4, %cst_4 {dimension_numbers = #tpu.dot_dimension_numbers<[1], [0], [0], [1], [0, 0, 1, 1], [], []>} : vector<16x16xbf16>, vector<16x32xbf16>, vector<16x32xf32> -> vector<16x32xf32>
    %c0_5 = arith.constant 0 : index
    %c0_6 = arith.constant 0 : index
    %6 = vector.load %arg2[%c0_5, %c0_6] : memref<24x32xf32, #tpu.memory_space<vmem>>, vector<1x32xf32>
    %7 = vector.broadcast %6 : vector<1x32xf32> to vector<16x32xf32>
    %8 = arith.addf %5, %7 : vector<16x32xf32>
    %cst_7 = arith.constant 0.000000e+00 : f32
    %9 = vector.broadcast %cst_7 : f32 to vector<16x32xf32>
    %10 = arith.maximumf %8, %9 : vector<16x32xf32>
    %11 = tpu.iota {dimensions = array<i32: 0>} : vector<16x32xi32>
    %c8_i32 = arith.constant 8 : i32
    %c0_i32 = arith.constant 0 : i32
    %12 = arith.cmpi eq, %c8_i32, %c0_i32 : i32
    %c1_i32 = arith.constant 1 : i32
    %13 = arith.select %12, %c1_i32, %c8_i32 : i32
    %14 = vector.broadcast %13 : i32 to vector<16x32xi32>
    %15 = arith.remsi %11, %14 : vector<16x32xi32>
    %c0_i32_8 = arith.constant 0 : i32
    %16 = vector.broadcast %c0_i32_8 : i32 to vector<16x32xi32>
    %17 = arith.cmpi ne, %15, %16 : vector<16x32xi32>
    %c0_i32_9 = arith.constant 0 : i32
    %18 = vector.broadcast %c0_i32_9 : i32 to vector<16x32xi32>
    %19 = arith.cmpi slt, %15, %18 : vector<16x32xi32>
    %c0_i32_10 = arith.constant 0 : i32
    %20 = arith.cmpi slt, %13, %c0_i32_10 : i32
    %21 = vector.broadcast %20 : i1 to vector<16x32xi1>
    %22 = vector.broadcast %21 : vector<16x32xi1> to vector<16x32xi1>
    %23 = arith.xori %19, %22 : vector<16x32xi1>
    %24 = arith.andi %23, %17 : vector<16x32xi1>
    %25 = vector.broadcast %13 : i32 to vector<16x32xi32>
    %26 = arith.addi %15, %25 : vector<16x32xi32>
    %27 = arith.select %24, %26, %15 : vector<16x32xi1>, vector<16x32xi32>
    %c2_i32 = arith.constant 2 : i32
    %28 = vector.broadcast %c2_i32 : i32 to vector<16x32xi32>
    %29 = arith.cmpi sge, %27, %28 : vector<16x32xi32>
    %c2_i32_11 = arith.constant 2 : i32
    %30 = tpu.dynamic_rotate %10 by %c2_i32_11 dim 0 : vector<16x32xf32>, i32 -> vector<16x32xf32>
    %cst_12 = arith.constant 0.000000e+00 : f32
    %31 = vector.broadcast %cst_12 : f32 to vector<16x32xf32>
    %32 = arith.select %29, %30, %31 : vector<16x32xi1>, vector<16x32xf32>
    %c6_i32 = arith.constant 6 : i32
    %33 = vector.broadcast %c6_i32 : i32 to vector<16x32xi32>
    %34 = arith.cmpi slt, %27, %33 : vector<16x32xi32>
    %c14_i32 = arith.constant 14 : i32
    %35 = tpu.dynamic_rotate %10 by %c14_i32 dim 0 : vector<16x32xf32>, i32 -> vector<16x32xf32>
    %cst_13 = arith.constant 0.000000e+00 : f32
    %36 = vector.broadcast %cst_13 : f32 to vector<16x32xf32>
    %37 = arith.select %34, %35, %36 : vector<16x32xi1>, vector<16x32xf32>
    %38 = arith.truncf %32 : vector<16x32xf32> to vector<16x32xbf16>
    %c32 = arith.constant 32 : index
    %c0_14 = arith.constant 0 : index
    %39 = vector.load %arg1[%c32, %c0_14] : memref<176x32xbf16, #tpu.memory_space<vmem>>, vector<32x32xbf16>
    %cst_15 = arith.constant dense<0.000000e+00> : vector<16x32xf32>
    %40 = tpu.matmul %38, %39, %cst_15 {dimension_numbers = #tpu.dot_dimension_numbers<[1], [0], [0], [1], [0, 0, 1, 1], [], []>} : vector<16x32xbf16>, vector<32x32xbf16>, vector<16x32xf32> -> vector<16x32xf32>
    %41 = arith.truncf %10 : vector<16x32xf32> to vector<16x32xbf16>
    %c64 = arith.constant 64 : index
    %c0_16 = arith.constant 0 : index
    %42 = vector.load %arg1[%c64, %c0_16] : memref<176x32xbf16, #tpu.memory_space<vmem>>, vector<32x32xbf16>
    %cst_17 = arith.constant dense<0.000000e+00> : vector<16x32xf32>
    %43 = tpu.matmul %41, %42, %cst_17 {dimension_numbers = #tpu.dot_dimension_numbers<[1], [0], [0], [1], [0, 0, 1, 1], [], []>} : vector<16x32xbf16>, vector<32x32xbf16>, vector<16x32xf32> -> vector<16x32xf32>
    %44 = arith.addf %40, %43 : vector<16x32xf32>
    %45 = arith.truncf %37 : vector<16x32xf32> to vector<16x32xbf16>
    %c96 = arith.constant 96 : index
    %c0_18 = arith.constant 0 : index
    %46 = vector.load %arg1[%c96, %c0_18] : memref<176x32xbf16, #tpu.memory_space<vmem>>, vector<32x32xbf16>
    %cst_19 = arith.constant dense<0.000000e+00> : vector<16x32xf32>
    %47 = tpu.matmul %45, %46, %cst_19 {dimension_numbers = #tpu.dot_dimension_numbers<[1], [0], [0], [1], [0, 0, 1, 1], [], []>} : vector<16x32xbf16>, vector<32x32xbf16>, vector<16x32xf32> -> vector<16x32xf32>
    %48 = arith.addf %44, %47 : vector<16x32xf32>
    %c8 = arith.constant 8 : index
    %c0_20 = arith.constant 0 : index
    %49 = vector.load %arg2[%c8, %c0_20] : memref<24x32xf32, #tpu.memory_space<vmem>>, vector<1x32xf32>
    %50 = vector.broadcast %49 : vector<1x32xf32> to vector<16x32xf32>
    %51 = arith.addf %48, %50 : vector<16x32xf32>
    %cst_21 = arith.constant 0.000000e+00 : f32
    %52 = vector.broadcast %cst_21 : f32 to vector<16x32xf32>
    %53 = arith.maximumf %51, %52 : vector<16x32xf32>
    %c128 = arith.constant 128 : index
    %c0_22 = arith.constant 0 : index
    %54 = vector.load %arg1[%c128, %c0_22] : memref<176x32xbf16, #tpu.memory_space<vmem>>, vector<2x16xbf16>
    %55 = arith.truncf %53 : vector<16x32xf32> to vector<16x32xbf16>
    %cst_23 = arith.constant dense<0.000000e+00> : vector<2x32xf32>
    %56 = tpu.matmul %54, %55, %cst_23 {dimension_numbers = #tpu.dot_dimension_numbers<[1], [0], [0], [1], [0, 0, 1, 1], [], []>} : vector<2x16xbf16>, vector<16x32xbf16>, vector<2x32xf32> -> vector<2x32xf32>
    %c144 = arith.constant 144 : index
    %c0_24 = arith.constant 0 : index
    %57 = vector.load %arg1[%c144, %c0_24] : memref<176x32xbf16, #tpu.memory_space<vmem>>, vector<32x8xbf16>
    %58 = arith.truncf %56 : vector<2x32xf32> to vector<2x32xbf16>
    %cst_25 = arith.constant dense<0.000000e+00> : vector<2x8xf32>
    %59 = tpu.matmul %58, %57, %cst_25 {dimension_numbers = #tpu.dot_dimension_numbers<[1], [0], [0], [1], [0, 0, 1, 1], [], []>} : vector<2x32xbf16>, vector<32x8xbf16>, vector<2x8xf32> -> vector<2x8xf32>
    %c16_26 = arith.constant 16 : index
    %c0_27 = arith.constant 0 : index
    %60 = vector.load %arg2[%c16_26, %c0_27] : memref<24x32xf32, #tpu.memory_space<vmem>>, vector<1x8xf32>
    %61 = vector.broadcast %60 : vector<1x8xf32> to vector<2x8xf32>
    %62 = arith.addf %59, %61 : vector<2x8xf32>
    %c0_28 = arith.constant 0 : index
    %c0_29 = arith.constant 0 : index
    %63 = vector.load %arg3[%c0_28, %c0_29] : memref<2x8xf32, #tpu.memory_space<vmem>>, vector<2x8xf32>
    tpu.vector_store %arg3[%c0_28, %c0_29], %62 {strides = array<i32>} : memref<2x8xf32, #tpu.memory_space<vmem>>, vector<2x8xf32>,
    return
  }
}

</mosaic_0001>

<bundles_post_ra>
// kernel: tgnn_forward.1
= control target key start
LH: loop header
LB: loop body
LE: loop exit
PB: predicated region body
PF: predicated region fallthrough
CT: control target
= control target key end

     0   :  { %vm28_vm0 = vcmask 1043456   ;;  %v624_v2 = vmov 0.0   ;;  %vm625_vm1 = vmmov 0   ;;  %vm24_vm2 = vcmask 64512   ;;  %s759_s0 = inlined_call_operand.vmem [shape: bf16[16,8], index: 0, kind: input, shape index: {}]   ;;  %s760_s1 = inlined_call_operand.vmem [shape: bf16[176,32], index: 1, kind: input, shape index: {}]   ;;  %s761_s2 = inlined_call_operand.vmem [shape: f32[24,32], index: 2, kind: input, shape index: {}]   ;;  %s762_s3 = inlined_call_operand.hbm [shape: f32[2,8], index: 3, kind: output, shape index: {}]  }
   0x1   :  { %v18_v0 = vld [vmem:[%s760_s1 + $0x8] sm:$0xf]  ;;  %v590_v1 = vld [vmem:[%s759_s0] sm:$0xff]   ;;  %537 = vmatprep.subr.bf16.mxu0 %v624_v2  ;;  %539 = vmatprep.mubr.msk.bf16.mxu0 %vm625_vm1, %v624_v2 }
   0x2   :  { %v30_v3 = vsel %vm28_vm0, %v18_v0, 0  ;;  %543 = vmatprep.subr.bf16.mxu1 %v624_v2  ;;  %545 = vmatprep.mubr.msk.bf16.mxu1 %vm625_vm1, %v624_v2 }
   0x3   :  { %538 = vmatpush3.bf16.msra.mxu0 %v30_v3 }
   0x4   :  { %549 = vmatprep.subr.bf16.mxu0 %v624_v2 }
   0x6   :  { %540 = vmatmul.mubr.msk.bf16.vlgmr.msra.gmra.mrb[0].mxu0 %vm24_vm2, %v590_v1 }
   0x7   :  { %553 = vmatprep.mubr.msk.bf16.mxu0 %vm625_vm1, %v624_v2 }
   0x8   :  { %8 = vsyncpa [#allocation3], 0  ;;  %v591_v9 = vld [vmem:[%s760_s1] sm:$0xff]   ;;  %vm86_vm3 = vcmask 130048   ;;  %v593_v11 = vld [vmem:[%s760_s1 + $0x28] sm:$0xff]   ;;  %v133_v14 = vlaneseq  ;;  %vm200_vm7 = vcmask 261120  }
   0x9   :  { %v592_v10 = vld [vmem:[%s760_s1 + $0x20] sm:$0xff]   ;;  %v594_v12 = vld [vmem:[%s760_s1 + $0x10] sm:$0xff]   ;;  %v595_v13 = vld [vmem:[%s760_s1 + $0x18] sm:$0xff]   ;;  %s626_s14 = smov [#allocation2]   ;;  %vm483_vm11 = vcmask 58368  }
   0xa   :  { %550 = vmatpush3.bf16.msra.mxu0 %v592_v10  ;;  %v134_v15 = vshrl.u32 %v133_v14, 7  ;;  %v501_v16 = vld [vmem:[%s761_s2] ss:$0 sm:$0xff]  ;;  %v596_v33 = vld [vmem:[%s760_s1 + $0x30] sm:$0xff]   ;;  %v597_v46 = vld [vmem:[%s760_s1 + $0x38] sm:$0xff]   ;;  %s491_s15 = sshll.u32 %s626_s14, 4  ;;  %s492_s15 = int_to_ptr.vmem [resolvable:$true] %s491_s15 }
   0xb   :  { %551 = vmatprep.subr.bf16.mxu0 %v624_v2  ;;  %v598_v49 = vld [vmem:[%s760_s1 + $0x48] sm:$0xff]   ;;  %p605_p1 = scmp.lt.s32.totalorder %s492_s15, %s492_s15 }
   0xc   :  { %v135_v17 = vadd.s32 8, %v134_v15  ;;  %v140_v19 = vand.u32 7, %v134_v15  ;;  %vm164_vm5 = vcmp.lt.s32.totalorder %v134_v15, 2  ;;  %vm173_vm6 = vcmp.lt.s32.totalorder %v134_v15, 6  ;;  %v513_v61 = vld [vmem:[%s761_s2 + $0x8] ss:$0 sm:$0xff] }
   0xd   :  { %v515_v15 = vld [vmem:[%s761_s2 + $0x10] ss:$0 sm:$0xff] }
   0xe   :  { %552 = vmatpush3.bf16.msra.mxu0 %v593_v11  ;;  %v147_v23 = vand.u32 7, %v135_v17  ;;  %vm688_vm4 = vcmp.ge.s32.totalorder %v140_v19, 2  ;;  %vm696_vm9 = vcmp.lt.s32.totalorder %v140_v19, 6 }
   0xf   :  { %565 = vmatprep.subr.bf16.mxu0 %v624_v2 }
  0x10   :  { %vm692_vm8 = vcmp.ge.s32.totalorder %v147_v23, 2  ;;  %vm700_vm10 = vcmp.lt.s32.totalorder %v147_v23, 6 }
  0xd9   :  { %v66_v4 = vpop.f32.mrb[0].mxu0 }
  0xda   :  { %v541_v5 = vpop.f32.mrb[1].mxu0 }
  0xdb   :  { %v69_v6 = vpop.f32.mrb[2].mxu0 }
  0xdc   :  { %v75_v7 = vpack.c.bf16 %v69_v6, %v66_v4  ;;  %v542_v8 = vpop.f32.mrb[3].mxu0 }
  0xdd   :  { %v373_v8 = vld [vmem:[%s760_s1 + $0x40] sm:$0x1] }
  0xde   :  { %544 = vmatpush3.bf16.msra.mxu1 %v75_v7 }
  0xdf   :  { %557 = vmatprep.subr.bf16.mxu1 %v624_v2 }
  0xe1   :  { %546 = vmatmul.mubr.msk.bf16.vlgmr.msra.gmra.mrb[0].mxu1 %vm86_vm3, %v591_v9  ;;  %v599_v9 = vld [vmem:[%s760_s1 + $0x50] sm:$0xff]   ;;  %s600_s1 = scalar_lea.vmem %s492_s15, 32 }
  0xe2   :  { %561 = vmatprep.mubr.msk.bf16.mxu1 %vm625_vm1, %v624_v2  ;;  %558 = vmatpush3.bf16.msra.mxu1 %v594_v12  ;;  %p601_p0 = scmp.ne.s32.totalorder %s492_s15, %s600_s1  ;;  %p606_p2 = scmp.lt.s32.totalorder %s600_s1, %s600_s1 }
  0xe3   :  { %559 = vmatprep.subr.bf16.mxu1 %v624_v2 }
  0xe4   :  { %p607_p3 = por %p606_p2, %p605_p1 }
  0xe6   :  { %560 = vmatpush3.bf16.msra.mxu1 %v595_v13  ;;  %p608_p4 = pnand %p607_p3, %p601_p0 }
  0xe7   :  { %573 = vmatprep.subr.bf16.mxu1 %v624_v2 }
 0x1b4   :  { %v124_v18 = vpop.f32.mrb[0].mxu1 }
 0x1b5   :  { %v125_v20 = vadd.f32 %v501_v16, %v124_v18  ;;  %v547_v21 = vpop.f32.mrb[1].mxu1 }
 0x1b6   :  { %v127_v22 = vpop.f32.mrb[2].mxu1 }
 0x1b7   :  { %v131_v24 = vmax.f32 %v125_v20, 0.0  ;;  %v128_v25 = vadd.f32 %v501_v16, %v127_v22  ;;  %v548_v26 = vpop.f32.mrb[3].mxu1 }
 0x1b9   :  { %v132_v28 = vmax.f32 %v128_v25, 0.0  ;;  %v162_v29 = vrot.slane %v131_v24, 6  ;;  %v171_v34 = vrot.slane %v131_v24, 2 }
 0x1bb   :  { %v163_v35 = vrot.slane %v132_v28, 6  ;;  %v172_v36 = vrot.slane %v132_v28, 2  ;;  %v183_v37 = vpack.c.bf16 %v132_v28, %v131_v24 }
 0x1bd   :  { %v165_v38 = vsel %vm164_vm5, %v162_v29, %v163_v35  ;;  %v166_v39 = vsel %vm164_vm5, %v163_v35, %v162_v29  ;;  %v174_v40 = vsel %vm173_vm6, %v171_v34, %v172_v36  ;;  %v175_v41 = vsel %vm173_vm6, %v172_v36, %v171_v34  ;;  %554 = vmatmul.mubr.msk.bf16.vlgmr.msra.gmra.mrb[4].mxu0 %vm200_vm7, %v183_v37 }
 0x1be   :  { %v167_v42 = vsel %vm688_vm4, %v166_v39, 0.0  ;;  %v168_v43 = vsel %vm692_vm8, %v165_v38, 0.0  ;;  %v176_v44 = vsel %vm696_vm9, %v174_v40, 0.0  ;;  %v177_v45 = vsel %vm700_vm10, %v175_v41, 0.0  ;;  %566 = vmatpush3.bf16.msra.mxu0 %v596_v33  ;;  %569 = vmatprep.mubr.msk.bf16.mxu0 %vm625_vm1, %v624_v2 }
 0x1bf   :  { %v178_v47 = vpack.c.bf16 %v168_v43, %v167_v42  ;;  %567 = vmatprep.subr.bf16.mxu0 %v624_v2  ;;  %v301_v48 = vpack.c.bf16 %v177_v45, %v176_v44 }
 0x1c1   :  { %562 = vmatmul.mubr.msk.bf16.vlgmr.msra.gmra.mrb[4].mxu1 %vm200_vm7, %v178_v47 }
 0x1c2   :  { %568 = vmatpush3.bf16.msra.mxu0 %v597_v46  ;;  %575 = vmatprep.mubr.msk.bf16.mxu1 %vm625_vm1, %v624_v2 }
 0x1c3   :  { %579 = vmatprep.subr.bf16.mxu0 %v624_v2 }
 0x1c5   :  { %570 = vmatmul.mubr.msk.bf16.vlgmr.msra.gmra.mrb[8].mxu0 %vm200_vm7, %v301_v48 }
 0x1c6   :  { %583 = vmatprep.mubr.msk.bf16.mxu0 %vm625_vm1, %v624_v2  ;;  %580 = vmatpush3.bf16.msra.mxu0 %v598_v49 }
 0x1c7   :  { %581 = vmatprep.subr.bf16.mxu0 %v624_v2 }
 0x1ca   :  { %582 = vmatpush3.bf16.msra.mxu0 %v599_v9 }
 0x290   :  { %v238_v50 = vpop.f32.mrb[4].mxu0 }
 0x291   :  { %v555_v51 = vpop.f32.mrb[5].mxu0 }
 0x292   :  { %v241_v52 = vpop.f32.mrb[6].mxu0 }
 0x293   :  { %v556_v53 = vpop.f32.mrb[7].mxu0 }
 0x294   :  { %v294_v54 = vpop.f32.mrb[4].mxu1 }
 0x295   :  { %v295_v55 = vadd.f32 %v294_v54, %v238_v50  ;;  %v563_v56 = vpop.f32.mrb[5].mxu1 }
 0x296   :  { %v297_v57 = vpop.f32.mrb[6].mxu1 }
 0x297   :  { %v298_v58 = vadd.f32 %v297_v57, %v241_v52  ;;  %v564_v59 = vpop.f32.mrb[7].mxu1 }
 0x298   :  { %v355_v60 = vpop.f32.mrb[8].mxu0 }
 0x299   :  { %v362_v62 = vadd.f32 %v355_v60, %v295_v55  ;;  %v571_v63 = vpop.f32.mrb[9].mxu0 }
 0x29a   :  { %v358_v0 = vpop.f32.mrb[10].mxu0 }
 0x29b   :  { %v369_v1 = vadd.f32 %v513_v61, %v362_v62  ;;  %v363_v2 = vadd.f32 %v358_v0, %v298_v58  ;;  %v572_v3 = vpop.f32.mrb[11].mxu0 }
 0x29d   :  { %v370_v4 = vadd.f32 %v513_v61, %v363_v2  ;;  %v371_v5 = vmax.f32 %v369_v1, 0.0 }
 0x29f   :  { %v372_v6 = vmax.f32 %v370_v4, 0.0 }
 0x2a1   :  { %v374_v7 = vpack.c.bf16 %v372_v6, %v371_v5 }
 0x2a3   :  { %574 = vmatpush3.bf16.msra.mxu1 %v374_v7 }
 0x2a6   :  { %576 = vmatmul.mubr.msk.bf16.vlgmr.msra.gmra.mrb[8].mxu1 %vm86_vm3, %v373_v8 }
 0x379   :  { %v412_v10 = vpop.f32.mrb[8].mxu1 }
 0x37a   :  { %v422_v11 = vpack.c.bf16 %v412_v10, %v412_v10  ;;  %v577_v12 = vpop.f32.mrb[9].mxu1 }
 0x37b   :  { %v415_v13 = vpop.f32.mrb[10].mxu1 }
 0x37c   :  { %v578_v14 = vpop.f32.mrb[11].mxu1  ;;  %584 = vmatmul.mubr.msk.bf16.vlgmr.msra.gmra.mrb[12].mxu0 %vm200_vm7, %v422_v11 }
 0x44f   :  { %v477_v16 = vpop.f32.mrb[12].mxu0 }
 0x450   :  { %v478_v17 = vadd.f32 %v515_v15, %v477_v16  ;;  %v585_v18 = vpop.f32.mrb[13].mxu0 }
 0x451   :  { %v480_v19 = vpop.f32.mrb[14].mxu0 }
 0x452   :  { %v586_v20 = vpop.f32.mrb[15].mxu0  ;;  %484 = vst.msk [vmem:[#allocation2] sm:$0x3] %vm483_vm11, %v478_v17 }
 0x453   :  { %611 = shalt.err (!%p608_p4)
}
 0x454   :  { %s612_s2 = scalar_lea.hbm %s762_s3, 32 }
 0x455   :  { %p613_p5 = scmp.ne.s32.totalorder %s762_s3, %s612_s2  ;;  %p616_p6 = scmp.lt.u32.totalorder %s612_s2, %s762_s3 }
 0x457   :  { %p618_p7 = pnand %p616_p6, %p613_p5 }
 0x459   :  { %621 = shalt.err (!%p618_p7)
}
 0x45a   :  { %494 = dma.vmem_to_hbm [thread:$0]  %s492_s15, 32, %s762_s3, [#allocation3]  }
 0x45b   :  { %622 = dma.done.wait [#allocation3], 32  }
 0x45c   :  { %623 = vsyncadd [#allocation3], 4294967264 }
 0x45d   :  { %498 = vsyncpa [#allocation3], 1 }

</bundles_post_ra>
